<compile_context>
chip_gen: v7x
topology: tpu7x:2x2x1
jax: 0.10.0
libtpu: 0.0.40
codegen_flags: <defaults>
</compile_context>

<pallas_src>
import functools
import math

import jax
import jax.numpy as jnp
from jax import lax
from jax.experimental import pallas as pl
from jax.experimental.pallas import tpu as pltpu


def _round_up(x: int, m: int) -> int:
    return ((x + m - 1) // m) * m


def _posenc_kernel(x_ref, o_ref, *, in_channel: int, frequencies: int):
    C = in_channel
    F = frequencies
    oc = C + 2 * C * F

    x = x_ref[...].astype(jnp.float32)                 # (tm, C)

    # ---- per-output-channel metadata on a single (1, oc) row ------------
    k = lax.broadcasted_iota(jnp.int32, (1, oc), 1)    # 0 .. oc-1 along lanes
    is_pass = k < C                                    # passthrough coords
    ke = jnp.maximum(k - C, 0)                         # index within encoding
    freq = jnp.zeros_like(ke)                          # frequency block id
    for i in range(1, F):
        freq = freq + (ke >= (2 * C * i)).astype(jnp.int32)
    p = ke - freq * (2 * C)                            # position in freq block
    chan_enc = jnp.right_shift(p, 1)                   # source channel
    is_cos = jnp.equal(jnp.bitwise_and(p, 1), 1)       # odd slot -> cos
    chan = jnp.where(is_pass, k, chan_enc)

    # scale_k = fl32(2^i * pi); exact power-of-two scaling matches the
    # reference's f32 rounding of (2**i)*math.pi.
    scale = jnp.full((1, oc), math.pi, dtype=jnp.float32)
    for i in range(1, F):
        scale = jnp.where(freq == i, jnp.float32(math.pi * (2.0 ** i)), scale)

    # ---- replicate source channels across output lanes (no relayouts) ----
    cols = [x[:, j:j + 1] for j in range(C)]           # each (tm, 1)
    xg = cols[C - 1]
    for j in range(C - 2, -1, -1):
        xg = jnp.where(chan == j, cols[j], xg)         # -> (tm, oc)

    # ---- fused, lane-dense encode + single full-block store --------------
    arg = xg * scale                                   # exact f32 mul
    s = jnp.sin(arg)
    c = jnp.cos(arg)
    enc = jnp.where(is_cos, c, s)
    out = jnp.where(is_pass, xg, enc)
    o_ref[...] = out.astype(o_ref.dtype)


def pos_encoding_nerf(coords: jax.Array, in_channel: int, frequencies: int = 10,
                      *, tile_rows: int = 2048) -> jax.Array:
    """Exact port of PosEncodingNeRF.forward (row tile amortizes grid overhead;
    raise tile_rows up to ~8192 for very large inputs if desired)."""
    C = in_channel
    F = frequencies
    oc = C + 2 * C * F

    B = coords.shape[0]
    coords3 = coords.reshape(B, -1, C)                 # (B, N, C)
    N = coords3.shape[1]
    M = B * N
    x2d = coords3.reshape(M, C)                        # (M, C)

    # Row tile: multiple of 8, capped by tile_rows; pad M to a tile multiple
    # (never a single all-rows block).
    tm = min(tile_rows, _round_up(max(M, 1), 8))
    tm = max(8, (tm // 8) * 8)
    m_pad = _round_up(M, tm)
    if m_pad != M:
        x2d = jnp.pad(x2d, ((0, m_pad - M), (0, 0)))

    kernel = functools.partial(_posenc_kernel, in_channel=C, frequencies=F)

    out2d = pl.pallas_call(
        kernel,
        out_shape=jax.ShapeDtypeStruct((m_pad, oc), coords.dtype),
        grid_spec=pltpu.PrefetchScalarGridSpec(
            num_scalar_prefetch=0,
            grid=(m_pad // tm,),
            in_specs=[pl.BlockSpec((tm, C), lambda i: (i, 0))],
            out_specs=pl.BlockSpec((tm, oc), lambda i: (i, 0)),
        ),
        compiler_params=pltpu.CompilerParams(
            dimension_semantics=("parallel",)),
    )(x2d)

    out = out2d[:M].reshape(B, N, oc)
    # torch .squeeze(1): only drops the middle axis if it is size 1
    if out.shape[1] == 1:
        out = out.reshape(B, oc)
    return out


def _reference(coords: jax.Array, in_channel: int, frequencies: int) -> jax.Array:
    """Plain-JAX replica of the PyTorch forward, for verification."""
    B = coords.shape[0]
    c3 = coords.reshape(B, -1, in_channel)
    parts = [c3]
    for i in range(frequencies):
        for j in range(in_channel):
            cj = c3[..., j]
            parts.append(jnp.sin((2 ** i) * math.pi * cj)[..., None])
            parts.append(jnp.cos((2 ** i) * math.pi * cj)[..., None])
    out = jnp.concatenate(parts, axis=-1)
    oc = in_channel + 2 * in_channel * frequencies
    out = out.reshape(B, -1, oc)
    if out.shape[1] == 1:
        out = out.reshape(B, oc)
    return out


if __name__ == "__main__":
    key = jax.random.PRNGKey(0)
    k1, k2 = jax.random.split(key)

    # Case 1: small shapes consistent with the module (batch=2, 8 pts, 4 ch).
    B, N, C, F = 2, 8, 4, 10
    coords = jax.random.uniform(k1, (B, N, C), dtype=jnp.float32,
                                minval=-1.0, maxval=1.0)
    out = jax.block_until_ready(pos_encoding_nerf(coords, in_channel=C,
                                                  frequencies=F))
    ref = _reference(coords, C, F)
    assert out.shape == (B, N, C + 2 * C * F), out.shape
    assert jnp.allclose(out, ref, atol=1e-5, rtol=1e-5), "mismatch vs reference"

    # Case 2: non-power-of-two channels + multi-step grid + row-padding path.
    B2, N2, C2, F2 = 2, 100, 3, 10
    coords2 = jax.random.uniform(k2, (B2, N2, C2), dtype=jnp.float32,
                                 minval=-1.0, maxval=1.0)
    out2 = jax.block_until_ready(
        pos_encoding_nerf(coords2, in_channel=C2, frequencies=F2, tile_rows=64))
    ref2 = _reference(coords2, C2, F2)
    assert out2.shape == (B2, N2, C2 + 2 * C2 * F2), out2.shape
    assert jnp.allclose(out2, ref2, atol=1e-5, rtol=1e-5), "mismatch vs reference (case 2)"

    print("KERNEL_OK")
</pallas_src>

<mosaic_0001>
module attributes {stable_mosaic.version = 11 : i64} {
  func.func @_posenc_kernel(%arg0: i32, %arg1: memref<16x4xf32, #tpu.memory_space<vmem>>, %arg2: memref<16x84xf32, #tpu.memory_space<vmem>>) attributes {dimension_semantics = [#tpu.dimension_semantics<parallel>], iteration_bounds = array<i64: 1>, scalar_prefetch = 0 : i64, scratch_operands = 0 : i64, tpu.core_type = #tpu.core_type<tc>, window_params = [{transform_indices = @transform_0, window_bounds = array<i64: 16, 4>}, {transform_indices = @transform_1, window_bounds = array<i64: 16, 84>}]} {
    %c0 = arith.constant 0 : index
    %c0_0 = arith.constant 0 : index
    %0 = vector.load %arg1[%c0, %c0_0] : memref<16x4xf32, #tpu.memory_space<vmem>>, vector<16x4xf32>
    %1 = tpu.iota {dimensions = array<i32: 1>} : vector<1x84xi32>
    %c4_i32 = arith.constant 4 : i32
    %2 = vector.broadcast %c4_i32 : i32 to vector<1x84xi32>
    %3 = arith.cmpi slt, %1, %2 : vector<1x84xi32>
    %c4_i32_1 = arith.constant 4 : i32
    %4 = vector.broadcast %c4_i32_1 : i32 to vector<1x84xi32>
    %5 = arith.subi %1, %4 : vector<1x84xi32>
    %c0_i32 = arith.constant 0 : i32
    %6 = vector.broadcast %c0_i32 : i32 to vector<1x84xi32>
    %7 = arith.maxsi %5, %6 : vector<1x84xi32>
    %c0_i32_2 = arith.constant 0 : i32
    %8 = vector.broadcast %c0_i32_2 : i32 to vector<1x84xi32>
    %c8_i32 = arith.constant 8 : i32
    %9 = vector.broadcast %c8_i32 : i32 to vector<1x84xi32>
    %10 = arith.cmpi sge, %7, %9 : vector<1x84xi32>
    %11 = arith.extui %10 : vector<1x84xi1> to vector<1x84xi32>
    %12 = arith.addi %8, %11 : vector<1x84xi32>
    %c16_i32 = arith.constant 16 : i32
    %13 = vector.broadcast %c16_i32 : i32 to vector<1x84xi32>
    %14 = arith.cmpi sge, %7, %13 : vector<1x84xi32>
    %15 = arith.extui %14 : vector<1x84xi1> to vector<1x84xi32>
    %16 = arith.addi %12, %15 : vector<1x84xi32>
    %c24_i32 = arith.constant 24 : i32
    %17 = vector.broadcast %c24_i32 : i32 to vector<1x84xi32>
    %18 = arith.cmpi sge, %7, %17 : vector<1x84xi32>
    %19 = arith.extui %18 : vector<1x84xi1> to vector<1x84xi32>
    %20 = arith.addi %16, %19 : vector<1x84xi32>
    %c32_i32 = arith.constant 32 : i32
    %21 = vector.broadcast %c32_i32 : i32 to vector<1x84xi32>
    %22 = arith.cmpi sge, %7, %21 : vector<1x84xi32>
    %23 = arith.extui %22 : vector<1x84xi1> to vector<1x84xi32>
    %24 = arith.addi %20, %23 : vector<1x84xi32>
    %c40_i32 = arith.constant 40 : i32
    %25 = vector.broadcast %c40_i32 : i32 to vector<1x84xi32>
    %26 = arith.cmpi sge, %7, %25 : vector<1x84xi32>
    %27 = arith.extui %26 : vector<1x84xi1> to vector<1x84xi32>
    %28 = arith.addi %24, %27 : vector<1x84xi32>
    %c48_i32 = arith.constant 48 : i32
    %29 = vector.broadcast %c48_i32 : i32 to vector<1x84xi32>
    %30 = arith.cmpi sge, %7, %29 : vector<1x84xi32>
    %31 = arith.extui %30 : vector<1x84xi1> to vector<1x84xi32>
    %32 = arith.addi %28, %31 : vector<1x84xi32>
    %c56_i32 = arith.constant 56 : i32
    %33 = vector.broadcast %c56_i32 : i32 to vector<1x84xi32>
    %34 = arith.cmpi sge, %7, %33 : vector<1x84xi32>
    %35 = arith.extui %34 : vector<1x84xi1> to vector<1x84xi32>
    %36 = arith.addi %32, %35 : vector<1x84xi32>
    %c64_i32 = arith.constant 64 : i32
    %37 = vector.broadcast %c64_i32 : i32 to vector<1x84xi32>
    %38 = arith.cmpi sge, %7, %37 : vector<1x84xi32>
    %39 = arith.extui %38 : vector<1x84xi1> to vector<1x84xi32>
    %40 = arith.addi %36, %39 : vector<1x84xi32>
    %c72_i32 = arith.constant 72 : i32
    %41 = vector.broadcast %c72_i32 : i32 to vector<1x84xi32>
    %42 = arith.cmpi sge, %7, %41 : vector<1x84xi32>
    %43 = arith.extui %42 : vector<1x84xi1> to vector<1x84xi32>
    %44 = arith.addi %40, %43 : vector<1x84xi32>
    %c8_i32_3 = arith.constant 8 : i32
    %45 = vector.broadcast %c8_i32_3 : i32 to vector<1x84xi32>
    %46 = arith.muli %44, %45 : vector<1x84xi32>
    %47 = arith.subi %7, %46 : vector<1x84xi32>
    %c1_i32 = arith.constant 1 : i32
    %48 = vector.broadcast %c1_i32 : i32 to vector<1x84xi32>
    %49 = arith.shrsi %47, %48 : vector<1x84xi32>
    %c1_i32_4 = arith.constant 1 : i32
    %50 = vector.broadcast %c1_i32_4 : i32 to vector<1x84xi32>
    %51 = arith.andi %47, %50 : vector<1x84xi32>
    %c1_i32_5 = arith.constant 1 : i32
    %52 = vector.broadcast %c1_i32_5 : i32 to vector<1x84xi32>
    %53 = arith.cmpi eq, %51, %52 : vector<1x84xi32>
    %54 = arith.select %3, %1, %49 : vector<1x84xi1>, vector<1x84xi32>
    %cst = arith.constant 3.14159274 : f32
    %55 = vector.broadcast %cst : f32 to vector<1x84xf32>
    %c1_i32_6 = arith.constant 1 : i32
    %56 = vector.broadcast %c1_i32_6 : i32 to vector<1x84xi32>
    %57 = arith.cmpi eq, %44, %56 : vector<1x84xi32>
    %cst_7 = arith.constant 6.28318548 : f32
    %58 = vector.broadcast %cst_7 : f32 to vector<1x84xf32>
    %59 = arith.select %57, %58, %55 : vector<1x84xi1>, vector<1x84xf32>
    %c2_i32 = arith.constant 2 : i32
    %60 = vector.broadcast %c2_i32 : i32 to vector<1x84xi32>
    %61 = arith.cmpi eq, %44, %60 : vector<1x84xi32>
    %cst_8 = arith.constant 12.566371 : f32
    %62 = vector.broadcast %cst_8 : f32 to vector<1x84xf32>
    %63 = arith.select %61, %62, %59 : vector<1x84xi1>, vector<1x84xf32>
    %c3_i32 = arith.constant 3 : i32
    %64 = vector.broadcast %c3_i32 : i32 to vector<1x84xi32>
    %65 = arith.cmpi eq, %44, %64 : vector<1x84xi32>
    %cst_9 = arith.constant 25.1327419 : f32
    %66 = vector.broadcast %cst_9 : f32 to vector<1x84xf32>
    %67 = arith.select %65, %66, %63 : vector<1x84xi1>, vector<1x84xf32>
    %c4_i32_10 = arith.constant 4 : i32
    %68 = vector.broadcast %c4_i32_10 : i32 to vector<1x84xi32>
    %69 = arith.cmpi eq, %44, %68 : vector<1x84xi32>
    %cst_11 = arith.constant 50.2654839 : f32
    %70 = vector.broadcast %cst_11 : f32 to vector<1x84xf32>
    %71 = arith.select %69, %70, %67 : vector<1x84xi1>, vector<1x84xf32>
    %c5_i32 = arith.constant 5 : i32
    %72 = vector.broadcast %c5_i32 : i32 to vector<1x84xi32>
    %73 = arith.cmpi eq, %44, %72 : vector<1x84xi32>
    %cst_12 = arith.constant 100.530968 : f32
    %74 = vector.broadcast %cst_12 : f32 to vector<1x84xf32>
    %75 = arith.select %73, %74, %71 : vector<1x84xi1>, vector<1x84xf32>
    %c6_i32 = arith.constant 6 : i32
    %76 = vector.broadcast %c6_i32 : i32 to vector<1x84xi32>
    %77 = arith.cmpi eq, %44, %76 : vector<1x84xi32>
    %cst_13 = arith.constant 201.061935 : f32
    %78 = vector.broadcast %cst_13 : f32 to vector<1x84xf32>
    %79 = arith.select %77, %78, %75 : vector<1x84xi1>, vector<1x84xf32>
    %c7_i32 = arith.constant 7 : i32
    %80 = vector.broadcast %c7_i32 : i32 to vector<1x84xi32>
    %81 = arith.cmpi eq, %44, %80 : vector<1x84xi32>
    %cst_14 = arith.constant 402.123871 : f32
    %82 = vector.broadcast %cst_14 : f32 to vector<1x84xf32>
    %83 = arith.select %81, %82, %79 : vector<1x84xi1>, vector<1x84xf32>
    %c8_i32_15 = arith.constant 8 : i32
    %84 = vector.broadcast %c8_i32_15 : i32 to vector<1x84xi32>
    %85 = arith.cmpi eq, %44, %84 : vector<1x84xi32>
    %cst_16 = arith.constant 804.247741 : f32
    %86 = vector.broadcast %cst_16 : f32 to vector<1x84xf32>
    %87 = arith.select %85, %86, %83 : vector<1x84xi1>, vector<1x84xf32>
    %c9_i32 = arith.constant 9 : i32
    %88 = vector.broadcast %c9_i32 : i32 to vector<1x84xi32>
    %89 = arith.cmpi eq, %44, %88 : vector<1x84xi32>
    %cst_17 = arith.constant 1608.49548 : f32
    %90 = vector.broadcast %cst_17 : f32 to vector<1x84xf32>
    %91 = arith.select %89, %90, %87 : vector<1x84xi1>, vector<1x84xf32>
    %92 = vector.extract_strided_slice %0 {offsets = [0, 0], sizes = [16, 1], strides = [1, 1]} : vector<16x4xf32> to vector<16x1xf32>
    %93 = vector.extract_strided_slice %0 {offsets = [0, 1], sizes = [16, 1], strides = [1, 1]} : vector<16x4xf32> to vector<16x1xf32>
    %94 = vector.extract_strided_slice %0 {offsets = [0, 2], sizes = [16, 1], strides = [1, 1]} : vector<16x4xf32> to vector<16x1xf32>
    %95 = vector.extract_strided_slice %0 {offsets = [0, 3], sizes = [16, 1], strides = [1, 1]} : vector<16x4xf32> to vector<16x1xf32>
    %c2_i32_18 = arith.constant 2 : i32
    %96 = vector.broadcast %c2_i32_18 : i32 to vector<1x84xi32>
    %97 = arith.cmpi eq, %54, %96 : vector<1x84xi32>
    %98 = vector.shape_cast %97 : vector<1x84xi1> to vector<1x84xi1>
    %99 = vector.broadcast %98 : vector<1x84xi1> to vector<16x84xi1>
    %100 = vector.shape_cast %94 : vector<16x1xf32> to vector<16x1xf32>
    %101 = vector.broadcast %100 : vector<16x1xf32> to vector<16x84xf32>
    %102 = vector.shape_cast %95 : vector<16x1xf32> to vector<16x1xf32>
    %103 = vector.broadcast %102 : vector<16x1xf32> to vector<16x84xf32>
    %104 = arith.select %99, %101, %103 : vector<16x84xi1>, vector<16x84xf32>
    %c1_i32_19 = arith.constant 1 : i32
    %105 = vector.broadcast %c1_i32_19 : i32 to vector<1x84xi32>
    %106 = arith.cmpi eq, %54, %105 : vector<1x84xi32>
    %107 = vector.shape_cast %106 : vector<1x84xi1> to vector<1x84xi1>
    %108 = vector.broadcast %107 : vector<1x84xi1> to vector<16x84xi1>
    %109 = vector.shape_cast %93 : vector<16x1xf32> to vector<16x1xf32>
    %110 = vector.broadcast %109 : vector<16x1xf32> to vector<16x84xf32>
    %111 = arith.select %108, %110, %104 : vector<16x84xi1>, vector<16x84xf32>
    %c0_i32_20 = arith.constant 0 : i32
    %112 = vector.broadcast %c0_i32_20 : i32 to vector<1x84xi32>
    %113 = arith.cmpi eq, %54, %112 : vector<1x84xi32>
    %114 = vector.shape_cast %113 : vector<1x84xi1> to vector<1x84xi1>
    %115 = vector.broadcast %114 : vector<1x84xi1> to vector<16x84xi1>
    %116 = vector.shape_cast %92 : vector<16x1xf32> to vector<16x1xf32>
    %117 = vector.broadcast %116 : vector<16x1xf32> to vector<16x84xf32>
    %118 = arith.select %115, %117, %111 : vector<16x84xi1>, vector<16x84xf32>
    %119 = vector.broadcast %91 : vector<1x84xf32> to vector<16x84xf32>
    %120 = arith.mulf %118, %119 : vector<16x84xf32>
    %121 = math.sin %120 : vector<16x84xf32>
    %122 = math.cos %120 : vector<16x84xf32>
    %123 = vector.shape_cast %53 : vector<1x84xi1> to vector<1x84xi1>
    %124 = vector.broadcast %123 : vector<1x84xi1> to vector<16x84xi1>
    %125 = arith.select %124, %122, %121 : vector<16x84xi1>, vector<16x84xf32>
    %126 = vector.shape_cast %3 : vector<1x84xi1> to vector<1x84xi1>
    %127 = vector.broadcast %126 : vector<1x84xi1> to vector<16x84xi1>
    %128 = arith.select %127, %118, %125 : vector<16x84xi1>, vector<16x84xf32>
    %c0_21 = arith.constant 0 : index
    %c0_22 = arith.constant 0 : index
    %129 = vector.load %arg2[%c0_21, %c0_22] : memref<16x84xf32, #tpu.memory_space<vmem>>, vector<16x84xf32>
    tpu.vector_store %arg2[%c0_21, %c0_22], %128 {strides = array<i32>} : memref<16x84xf32, #tpu.memory_space<vmem>>, vector<16x84xf32>,
    return
  }
  func.func @transform_0(%arg0: i32) -> (i32, i32) {
    %c0_i32 = arith.constant 0 : i32
    %c0_i32_0 = arith.constant 0 : i32
    return %arg0, %c0_i32 : i32, i32
  }
  func.func @transform_1(%arg0: i32) -> (i32, i32) {
    %c0_i32 = arith.constant 0 : i32
    %c0_i32_0 = arith.constant 0 : i32
    return %arg0, %c0_i32 : i32, i32
  }
}

</mosaic_0001>

<bundles_post_ra>
// kernel: tpu_custom_call.1
= control target key start
LH: loop header
LB: loop body
LE: loop exit
PB: predicated region body
PF: predicated region fallthrough
CT: control target
= control target key end

     0   :  { %v636_v1 = vmov 3   ;;  %v637_v2 = vmov 2   ;;  %s773_s0 = inlined_call_operand.vmem [shape: f32[16,4], index: 0, kind: input, shape index: {}]   ;;  %s774_s1 = inlined_call_operand.hbm [shape: f32[16,84], index: 1, kind: output, shape index: {}]  }
   0x1   :  { %v9_v0 = vld [vmem:[%s773_s0] sm:$0xff]  ;;  %599 = vset.pattern.permute.xlu1 %v636_v1  ;;  %598 = vset.pattern.permute.xlu0 %v637_v2 }
   0x2   :  { %6 = vsyncpa [#allocation3], 0  ;;  %81 = vperm.xlu1 %599, %v9_v0   ;;  %72 = vperm.xlu0 %598, %v9_v0   ;;  %v10_v3 = vld [vmem:[%s773_s0 + $0x8] sm:$0xff]  ;;  %v638_v4 = vmov 1   ;;  %v639_v5 = vmov 0   ;;  %v11_v6 = vlaneseq  ;;  %s647_s0 = smov [#allocation2]  }
   0x3   :  { %v640_v27 = vmov 3.1415927   ;;  %s548_s10 = sshll.u32 %s647_s0, 4  ;;  %s549_s10 = int_to_ptr.vmem [resolvable:$true] %s548_s10 }
   0x4   :  { %v666_v7 = vand.u32 127, %v11_v6  ;;  %s612_s11 = scalar_lea.vmem %s549_s10, 256  ;;  %p617_p1 = scmp.lt.s32.totalorder %s549_s10, %s549_s10 }
   0x5   :  { %p613_p0 = scmp.ne.s32.totalorder %s549_s10, %s612_s11  ;;  %p618_p2 = scmp.lt.s32.totalorder %s612_s11, %s612_s11 }
   0x6   :  { %85 = vperm.xlu1 %599, %v10_v3   ;;  %77 = vperm.xlu0 %598, %v10_v3   ;;  %v559_v8 = vadd.s32 4294967292, %v666_v7 }
   0x7   :  { %p619_p3 = por %p618_p2, %p617_p1 }
   0x8   :  { %vm15_vm0 = vcmp.gt.s32.totalorder %v559_v8, 0 }
   0x9   :  { %v16_v9 = vsel %vm15_vm0, %v559_v8, 0  ;;  %vm13_vm0 = vcmp.lt.s32.totalorder %v666_v7, 4  ;;  %p620_p4 = pnand %p619_p3, %p613_p0 }
   0xa   :  { %601 = vset.pattern.permute.xlu1 %v638_v4  ;;  %600 = vset.pattern.permute.xlu0 %v638_v4  ;;  %vm17_vm1 = vcmp.ge.s32.totalorder %v16_v9, 8  ;;  %vm19_vm2 = vcmp.ge.s32.totalorder %v16_v9, 16  ;;  %vm22_vm3 = vcmp.ge.s32.totalorder %v16_v9, 24  ;;  %vm25_vm4 = vcmp.ge.s32.totalorder %v16_v9, 32 }
   0xb   :  { %98 = vperm.xlu1 %601, %v10_v3   ;;  %94 = vperm.xlu0 %600, %v9_v0   ;;  %v18_v10 = vsel %vm17_vm1, 1, %v639_v5  ;;  %v20_v11 = vsel %vm19_vm2, 1, %v639_v5  ;;  %v23_v13 = vsel %vm22_vm3, 1, %v639_v5  ;;  %v26_v15 = vsel %vm25_vm4, 1, %v639_v5 }
   0xc   :  { %v21_v12 = vadd.s32 %v20_v11, %v18_v10  ;;  %vm28_vm5 = vcmp.ge.s32.totalorder %v16_v9, 40  ;;  %vm31_vm6 = vcmp.ge.s32.totalorder %v16_v9, 48  ;;  %vm34_vm7 = vcmp.ge.s32.totalorder %v16_v9, 56 }
   0xd   :  { %v29_v17 = vsel %vm28_vm5, 1, %v639_v5  ;;  %v32_v19 = vsel %vm31_vm6, 1, %v639_v5  ;;  %v35_v21 = vsel %vm34_vm7, 1, %v639_v5  ;;  %vm37_vm8 = vcmp.ge.s32.totalorder %v16_v9, 64 }
   0xe   :  { %v24_v14 = vadd.s32 %v23_v13, %v21_v12  ;;  %v38_v23 = vsel %vm37_vm8, 1, %v639_v5  ;;  %vm40_vm9 = vcmp.ge.s32.totalorder %v16_v9, 72 }
   0xf   :  { %602 = vset.pattern.permute.xlu1 %v639_v5  ;;  %603 = vset.pattern.permute.xlu0 %v639_v5  ;;  %v41_v25 = vsel %vm40_vm9, 1, %v639_v5 }
  0x10   :  { %107 = vperm.xlu1 %602, %v9_v0   ;;  %111 = vperm.xlu0 %603, %v10_v3   ;;  %v27_v16 = vadd.s32 %v26_v15, %v24_v14  ;;  %v641_v14 = vmov 683565275  }
  0x12   :  { %v30_v18 = vadd.s32 %v29_v17, %v27_v16 }
  0x14   :  { %v33_v20 = vadd.s32 %v32_v19, %v30_v18  ;;  %v642_v18 = vmov 2475754826  }
  0x16   :  { %v36_v22 = vadd.s32 %v35_v21, %v33_v20  ;;  %v643_v20 = vmov 2131351028  }
  0x18   :  { %v39_v24 = vadd.s32 %v38_v23, %v36_v22  ;;  %v644_v22 = vmov 2102212464  }
  0x1a   :  { %v42_v26 = vadd.s32 %v41_v25, %v39_v24  ;;  %v645_v24 = vmov 920167782  }
  0x1c   :  { %vm49_vm10 = vcmp.eq.s32.totalorder %v42_v26, 1  ;;  %vm51_vm11 = vcmp.eq.s32.totalorder %v42_v26, 2  ;;  %vm53_vm12 = vcmp.eq.s32.totalorder %v42_v26, 3  ;;  %v43_v30 = vmul.u32 8, %v42_v26 }
  0x1d   :  { %v50_v28 = vsel %vm49_vm10, 6.2831855, %v640_v27  ;;  %vm55_vm13 = vcmp.eq.s32.totalorder %v42_v26, 4  ;;  %vm57_vm14 = vcmp.eq.s32.totalorder %v42_v26, 5  ;;  %vm59_vm15 = vcmp.eq.s32.totalorder %v42_v26, 6 }
  0x1e   :  { %v52_v29 = vsel %vm51_vm11, 12.566371, %v50_v28  ;;  %v669_v33 = vsub.s32 %v16_v9, %v43_v30  ;;  %vm61_vm1 = vcmp.eq.s32.totalorder %v42_v26, 7  ;;  %vm63_vm2 = vcmp.eq.s32.totalorder %v42_v26, 8 }
  0x1f   :  { %v54_v31 = vsel %vm53_vm12, 25.132742, %v52_v29  ;;  %vm65_vm4 = vcmp.eq.s32.totalorder %v42_v26, 9 }
  0x20   :  { %v56_v32 = vsel %vm55_vm13, 50.265484, %v54_v31  ;;  %v45_v37 = vshra.s32 %v669_v33, 1  ;;  %v646_v31 = vmov 1326507024  }
  0x21   :  { %v58_v36 = vsel %vm57_vm14, 100.53097, %v56_v32 }
  0x22   :  { %v60_v40 = vsel %vm59_vm15, 201.06194, %v58_v36  ;;  %v48_v41 = vsel %vm13_vm0, %v666_v7, %v45_v37 }
  0x23   :  { %v62_v42 = vsel %vm61_vm1, 402.12387, %v60_v40  ;;  %vm67_vm3 = vcmp.eq.s32.totalorder %v48_v41, 2  ;;  %vm90_vm5 = vcmp.eq.s32.totalorder %v48_v41, 1  ;;  %vm103_vm6 = vcmp.eq.s32.totalorder %v48_v41, 0 }
  0x24   :  { %v64_v45 = vsel %vm63_vm2, 804.24774, %v62_v42 }
  0x25   :  { %v66_v48 = vsel %vm65_vm4, 1608.4955, %v64_v45 }
  0x81   :  { %v82_v34 = vpop.permute.xlu1 %81  ;;  %v73_v35 = vpop.permute.xlu0 %72 }
  0x82   :  { %v88_v46 = vsel %vm67_vm3, %v73_v35, %v82_v34 }
  0x85   :  { %v86_v38 = vpop.permute.xlu1 %85  ;;  %v78_v39 = vpop.permute.xlu0 %77 }
  0x86   :  { %v89_v47 = vsel %vm67_vm3, %v78_v39, %v86_v38 }
  0x8a   :  { %v99_v43 = vpop.permute.xlu1 %98  ;;  %v95_v44 = vpop.permute.xlu0 %94 }
  0x8b   :  { %v102_v49 = vsel %vm90_vm5, %v99_v43, %v89_v47  ;;  %v101_v50 = vsel %vm90_vm5, %v95_v44, %v88_v46 }
  0x8f   :  { %v108_v51 = vpop.permute.xlu1 %107  ;;  %v112_v52 = vpop.permute.xlu0 %111 }
  0x90   :  { %v676_v53 = vsel %vm103_vm6, %v108_v51, %v101_v50  ;;  %v678_v54 = vsel %vm103_vm6, %v112_v52, %v102_v49 }
  0x91   :  { %v681_v55 = vmul.f32 %v676_v53, %v66_v48  ;;  %v684_v56 = vmul.f32 %v678_v54, %v66_v48 }
  0x93   :  { %v118_v57 = vand.u32 2147483647, %v681_v55  ;;  %v121_v58 = vand.u32 2139095040, %v681_v55  ;;  %v225_v59 = vand.u32 2139095040, %v684_v56  ;;  %v222_v62 = vand.u32 2147483647, %v684_v56 }
  0x94   :  { %vm120_vm6 = vcmp.lt.s32.totalorder %v681_v55, 0 }
  0x95   :  { %v122_v60 = vshrl.u32 %v121_v58, 23  ;;  %v125_v61 = vand.u32 8388607, %v118_v57  ;;  %v226_v63 = vshrl.u32 %v225_v59, 23  ;;  %v694_v4 = vand.u32 8388607, %v222_v62 }
  0x97   :  { %v560_v0 = vadd.s32 4294967169, %v122_v60  ;;  %v564_v1 = vadd.s32 4294967169, %v226_v63  ;;  %v126_v3 = vor.u32 8388608, %v125_v61  ;;  %v230_v12 = vor.u32 8388608, %v694_v4 }
  0x99   :  { %v128_v2 = vadd.s32 1, %v560_v0  ;;  %v232_v5 = vadd.s32 1, %v564_v1  ;;  %v696_v11 = vshll.u32 %v126_v3, 8 }
  0x9b   :  { %vm129_vm7 = vcmp.gt.s32.totalorder %v128_v2, 0  ;;  %vm233_vm8 = vcmp.gt.s32.totalorder %v232_v5, 0 }
  0x9c   :  { %v130_v6 = vsel %vm129_vm7, %v128_v2, 0  ;;  %v234_v10 = vsel %vm233_vm8, %v232_v5, 0  ;;  %vm119_vm7 = vcmp.le.f32.partialorder %v118_v57, 0.7853982  ;;  %vm224_vm8 = vcmp.lt.s32.totalorder %v684_v56, 0 }
  0x9d   :  { %v131_v8 = vshrl.u32 %v130_v6, 5  ;;  %v132_v9 = vand.u32 31, %v130_v6  ;;  %v699_v16 = vshrl.u32 %v234_v10, 5  ;;  %v236_v17 = vand.u32 31, %v234_v10 }
  0x9f   :  { %v133_v13 = vsub.s32 32, %v132_v9  ;;  %v135_v15 = vshll.u32 %v641_v14, %v132_v9  ;;  %v138_v19 = vshll.u32 %v642_v18, %v132_v9  ;;  %v141_v21 = vshll.u32 %v643_v20, %v132_v9 }
  0xa0   :  { %v144_v23 = vshll.u32 %v644_v22, %v132_v9  ;;  %v147_v25 = vshll.u32 %v645_v24, %v132_v9  ;;  %vm150_vm9 = vcmp.lt.s32.totalorder %v131_v8, 1  ;;  %vm151_vm10 = vcmp.lt.s32.totalorder %v131_v8, 2 }
  0xa1   :  { %v136_v26 = vshrl.u32 %v642_v18, %v133_v13  ;;  %v139_v27 = vshrl.u32 %v643_v20, %v133_v13  ;;  %v142_v28 = vshrl.u32 %v644_v22, %v133_v13  ;;  %v134_v29 = vshrl.u32 %v641_v14, %v133_v13 }
  0xa2   :  { %v145_v30 = vshrl.u32 %v645_v24, %v133_v13  ;;  %v148_v32 = vshrl.u32 %v646_v31, %v133_v13  ;;  %v237_v37 = vsub.s32 32, %v236_v17  ;;  %vm152_vm11 = vcmp.lt.s32.totalorder %v131_v8, 3 }
  0xa3   :  { %v137_v34 = vor.u32 %v136_v26, %v135_v15  ;;  %v140_v35 = vor.u32 %v139_v27, %v138_v19  ;;  %v143_v36 = vor.u32 %v142_v28, %v141_v21  ;;  %vm153_vm12 = vcmp.lt.s32.totalorder %v131_v8, 4 }
  0xa4   :  { %v146_v38 = vor.u32 %v145_v30, %v144_v23  ;;  %v149_v39 = vor.u32 %v148_v32, %v147_v25  ;;  %v239_v47 = vshll.u32 %v641_v14, %v236_v17  ;;  %v240_v50 = vshrl.u32 %v642_v18, %v237_v37 }
  0xa5   :  { %v154_v40 = vsel %vm150_vm9, %v134_v29, %v137_v34  ;;  %v155_v41 = vsel %vm153_vm12, %v143_v36, 2102212464  ;;  %v158_v42 = vsel %vm150_vm9, %v137_v34, %v140_v35  ;;  %v162_v43 = vsel %vm150_vm9, %v140_v35, %v143_v36 }
  0xa6   :  { %v156_v44 = vsel %vm152_vm11, %v140_v35, %v155_v41  ;;  %v159_v45 = vsel %vm153_vm12, %v146_v38, 920167782  ;;  %v163_v46 = vsel %vm153_vm12, %v149_v39, 1326507024  ;;  %v242_v51 = vshll.u32 %v642_v18, %v236_v17 }
  0xa7   :  { %v160_v48 = vsel %vm152_vm11, %v143_v36, %v159_v45  ;;  %v164_v49 = vsel %vm152_vm11, %v146_v38, %v163_v46  ;;  %v157_v52 = vsel %vm151_vm10, %v154_v40, %v156_v44  ;;  %v243_v60 = vshrl.u32 %v643_v20, %v237_v37 }
  0xa8   :  { %v161_v58 = vsel %vm151_vm10, %v158_v42, %v160_v48  ;;  %v165_v59 = vsel %vm151_vm10, %v162_v43, %v164_v49  ;;  %v241_v2 = vor.u32 %v240_v50, %v239_v47  ;;  %v245_v4 = vshll.u32 %v643_v20, %v236_v17 }
  0xa9   :  { %v708_v61 = vmul.u32.u64.low %v696_v11, %v165_v59  ;;  %v709_v63 = vmul.u32.u64.high %v696_v11, %v165_v59, %v708_v61  ;;  %v712_v0 = vmul.u32.u64.low %v696_v11, %v161_v58  ;;  %v713_v1 = vmul.u32.u64.high %v696_v11, %v161_v58, %v712_v0 }
  0xaa   :  { %v244_v3 = vor.u32 %v243_v60, %v242_v51  ;;  %v246_v5 = vshrl.u32 %v644_v22, %v237_v37  ;;  %v248_v6 = vshll.u32 %v644_v22, %v236_v17  ;;  %v249_v9 = vshrl.u32 %v645_v24, %v237_v37 }
  0xab   :  { %v252_v10 = vshrl.u32 %v646_v31, %v237_v37  ;;  %v270_v13 = vshll.u32 %v230_v12, 8  ;;  %v173_v8 = vmul.u32 %v696_v11, %v157_v52  ;;  %v238_v15 = vshrl.u32 %v641_v14, %v237_v37 }
  0xac   :  { %v247_v18 = vor.u32 %v246_v5, %v245_v4  ;;  %v251_v19 = vshll.u32 %v645_v24, %v236_v17  ;;  %vm175_vm13 = vc.u32 %v709_v63, %v712_v0  ;;  %v176_v21 = vadd.s32 1, %v713_v1 }
  0xad   :  { %v250_v23 = vor.u32 %v249_v9, %v248_v6  ;;  %vm254_vm14 = vcmp.lt.s32.totalorder %v699_v16, 1  ;;  %vm256_vm15 = vcmp.lt.s32.totalorder %v699_v16, 3  ;;  %vm257_vm1 = vcmp.lt.s32.totalorder %v699_v16, 4 }
  0xae   :  { %v253_v25 = vor.u32 %v252_v10, %v251_v19  ;;  %v262_v20 = vsel %vm254_vm14, %v241_v2, %v244_v3  ;;  %v177_v12 = vsel %vm175_vm13, %v176_v21, %v713_v1  ;;  %v259_v22 = vsel %vm257_vm1, %v247_v18, 2102212464 }
  0xaf   :  { %v263_v11 = vsel %vm257_vm1, %v250_v23, 920167782  ;;  %v266_v14 = vsel %vm254_vm14, %v244_v3, %v247_v18  ;;  %v178_v26 = vadd.s32 %v177_v12, %v173_v8  ;;  %vm255_vm2 = vcmp.lt.s32.totalorder %v699_v16, 2 }
  0xb0   :  { %v264_v17 = vsel %vm256_vm15, %v247_v18, %v263_v11  ;;  %v267_v24 = vsel %vm257_vm1, %v253_v25, 1326507024  ;;  %v258_v27 = vsel %vm254_vm14, %v238_v15, %v241_v2  ;;  %v260_v28 = vsel %vm256_vm15, %v244_v3, %v259_v22 }
  0xb1   :  { %v265_v29 = vsel %vm255_vm2, %v262_v20, %v264_v17  ;;  %v268_v30 = vsel %vm256_vm15, %v250_v23, %v267_v24  ;;  %v179_v31 = vadd.s32 536870912, %v178_v26  ;;  %v261_v39 = vsel %vm255_vm2, %v258_v27, %v260_v28 }
  0xb2   :  { %v269_v32 = vsel %vm255_vm2, %v266_v14, %v268_v30  ;;  %v723_v34 = vmul.u32.u64.low %v270_v13, %v265_v29  ;;  %v724_v35 = vmul.u32.u64.high %v270_v13, %v265_v29, %v723_v34  ;;  %v277_v16 = vmul.u32 %v270_v13, %v261_v39 }
  0xb3   :  { %v726_v36 = vmul.u32.u64.low %v270_v13, %v269_v32  ;;  %v727_v37 = vmul.u32.u64.high %v270_v13, %v269_v32, %v726_v36  ;;  %v180_v38 = vshrl.u32 %v179_v31, 30  ;;  %v174_v60 = vadd.s32 %v712_v0, %v709_v63 }
  0xb4   :  { %v280_v41 = vadd.s32 1, %v724_v35  ;;  %vm223_vm9 = vcmp.le.f32.partialorder %v222_v62, 0.7853982  ;;  %vm210_vm2 = vweird.f32 %v681_v55 }
  0xb5   :  { %v181_v40 = vshll.u32 %v180_v38, 30  ;;  %vm279_vm3 = vc.u32 %v727_v37, %v723_v34  ;;  %v278_v21 = vadd.s32 %v723_v34, %v727_v37  ;;  %v204_v0 = vsub.s32 4, %v180_v38 }
  0xb6   :  { %v281_v43 = vsel %vm279_vm3, %v280_v41, %v724_v35  ;;  %v46_v37 = vand.u32 1, %v669_v33  ;;  %vm540_vm3 = vcmask 687104  }
  0xb7   :  { %v182_v42 = vsub.s32 %v178_v26, %v181_v40  ;;  %v282_v44 = vadd.s32 %v281_v43, %v277_v16  ;;  %v205_v24 = vsel %vm120_vm6, %v204_v0, %v180_v38 }
  0xb8   :  { %v207_v29 = vsel %vm119_vm7, 0, %v205_v24  ;;  %vm743_vm10 = vcmp.eq.s32.totalorder %v46_v37, 1 }
  0xb9   :  { %v184_v45 = vsub.s32 0, %v182_v42  ;;  %v283_v46 = vadd.s32 536870912, %v282_v44  ;;  %v211_v35 = vadd.s32 3, %v207_v29  ;;  %v419_v40 = vand.u32 3, %v207_v29 }
  0xbb   :  { %v561_v47 = vmin.u32 %v184_v45, %v182_v42  ;;  %v284_v48 = vshrl.u32 %v283_v46, 30  ;;  %v212_v39 = vand.u32 3, %v211_v35  ;;  %vm421_vm12 = vcmp.eq.s32.totalorder %v419_v40, 0 }
  0xbc   :  { %vm424_vm13 = vcmp.eq.s32.totalorder %v419_v40, 2  ;;  %vm420_vm1 = vcmp.lt.s32.totalorder %v419_v40, 2 }
  0xbd   :  { %v186_v49 = vclz %v561_v47  ;;  %v285_v50 = vshll.u32 %v284_v48, 30  ;;  %v308_v34 = vsub.s32 4, %v284_v48  ;;  %vm217_vm11 = vcmp.eq.s32.totalorder %v212_v39, 2 }
  0xbe   :  { %vm214_vm14 = vcmp.eq.s32.totalorder %v212_v39, 0  ;;  %vm213_vm15 = vcmp.lt.s32.totalorder %v212_v39, 2 }
  0xbf   :  { %v562_v51 = vadd.s32 4294967294, %v186_v49  ;;  %v286_v52 = vsub.s32 %v282_v44, %v285_v50  ;;  %v309_v38 = vsel %vm224_vm8, %v308_v34, %v284_v48 }
  0xc1   :  { %vm563_vm4 = vcmp.lt.s32.totalorder %v562_v51, 0  ;;  %v288_v59 = vsub.s32 0, %v286_v52 }
  0xc2   :  { %v189_v58 = vsel %vm563_vm4, 0, %v562_v51 }
  0xc3   :  { %v190_v61 = vsub.s32 32, %v189_v58  ;;  %v194_v1 = vsub.s32 4294967266, %v189_v58  ;;  %v565_v2 = vmin.u32 %v288_v59, %v286_v52  ;;  %v191_v3 = vshll.u32 %v182_v42, %v189_v58 }
  0xc4   :  { %v311_v42 = vsel %vm223_vm9, 0, %v309_v38 }
  0xc5   :  { %v192_v4 = vshrl.u32 %v174_v60, %v190_v61  ;;  %v195_v5 = vadd.s32 127, %v194_v1  ;;  %v290_v6 = vclz %v565_v2  ;;  %v315_v47 = vadd.s32 3, %v311_v42 }
  0xc6   :  { %v522_v61 = vand.u32 3, %v311_v42 }
  0xc7   :  { %v193_v9 = vor.u32 %v192_v4, %v191_v3  ;;  %v196_v10 = vshll.u32 %v195_v5, 23  ;;  %v566_v13 = vadd.s32 4294967294, %v290_v6  ;;  %v316_v60 = vand.u32 3, %v315_v47 }
  0xc9   :  { %v197_v8 = vor.u32 4788187, %v196_v10  ;;  %vm567_vm5 = vcmp.lt.s32.totalorder %v566_v13, 0  ;;  %v200_v18 = vcvt.s32.f32 %v193_v9  ;;  %vm321_vm4 = vcmp.eq.s32.totalorder %v316_v60, 2 }
  0xca   :  { %v293_v19 = vsel %vm567_vm5, 0, %v566_v13  ;;  %vm527_vm5 = vcmp.eq.s32.totalorder %v522_v61, 2 }
  0xcb   :  { %v198_v15 = vand.u32 2147483647, %v197_v8  ;;  %v294_v23 = vsub.s32 32, %v293_v19  ;;  %v298_v25 = vsub.s32 4294967266, %v293_v19  ;;  %v295_v20 = vshll.u32 %v286_v52, %v293_v19 }
  0xcd   :  { %v201_v63 = vmul.f32 %v200_v18, %v198_v15  ;;  %v296_v12 = vshrl.u32 %v278_v21, %v294_v23  ;;  %v299_v22 = vadd.s32 127, %v298_v25 }
  0xcf   :  { %v202_v11 = vxor.u32 2147483648, %v201_v63  ;;  %v297_v14 = vor.u32 %v296_v12, %v295_v20  ;;  %v300_v26 = vshll.u32 %v299_v22, 23 }
  0xd1   :  { %v203_v17 = vsel %vm120_vm6, %v202_v11, %v201_v63  ;;  %v301_v28 = vor.u32 4788187, %v300_v26  ;;  %v304_v31 = vcvt.s32.f32 %v297_v14  ;;  %vm318_vm6 = vcmp.eq.s32.totalorder %v316_v60, 0 }
  0xd2   :  { %v206_v27 = vsel %vm119_vm7, %v681_v55, %v203_v17  ;;  %vm524_vm7 = vcmp.eq.s32.totalorder %v522_v61, 0 }
  0xd3   :  { %604 = vcosq.f32 %v206_v27  ;;  %v302_v30 = vand.u32 2147483647, %v301_v28 }
  0xd4   :  { %606 = vsinq.f32 %v206_v27 }
  0xd5   :  { %v305_v32 = vmul.f32 %v304_v31, %v302_v30 }
  0xd7   :  { %v306_v36 = vxor.u32 2147483648, %v305_v32 }
  0xd9   :  { %v307_v57 = vsel %vm224_vm8, %v306_v36, %v305_v32  ;;  %vm317_vm8 = vcmp.lt.s32.totalorder %v316_v60, 2 }
  0xda   :  { %v310_v41 = vsel %vm223_vm9, %v684_v56, %v307_v57  ;;  %vm523_vm9 = vcmp.lt.s32.totalorder %v522_v61, 2 }
  0xdb   :  { %608 = vcosq.f32 %v310_v41 }
  0xdc   :  { %610 = vsinq.f32 %v310_v41 }
  0xdd   :  { %v605_v16 = vpop.eup %604 }
  0xde   :  { %v607_v43 = vpop.eup %606  ;;  %v218_v45 = vxor.u32 2147483648, %v605_v16 }
  0xdf   :  { %v215_v33 = vxor.u32 2147483648, %v607_v43 }
  0xe0   :  { %v219_v62 = vsel %vm217_vm11, %v218_v45, %v607_v43  ;;  %v426_v46 = vsel %vm424_vm13, %v218_v45, %v607_v43  ;;  %vm314_vm11 = vweird.f32 %v684_v56 }
  0xe1   :  { %v216_v48 = vsel %vm214_vm14, %v605_v16, %v215_v33  ;;  %v423_v49 = vsel %vm421_vm12, %v605_v16, %v215_v33 }
  0xe2   :  { %v220_v50 = vsel %vm213_vm15, %v216_v48, %v219_v62  ;;  %v427_v51 = vsel %vm420_vm1, %v423_v49, %v426_v46 }
  0xe3   :  { %v221_v52 = vsel %vm210_vm2, nan, %v220_v50  ;;  %v428_v58 = vsel %vm210_vm2, nan, %v427_v51 }
  0xe4   :  { %v534_v59 = vsel %vm743_vm10, %v428_v58, %v221_v52 }
  0xe5   :  { %v538_v1 = vsel %vm13_vm0, %v676_v53, %v534_v59  ;;  %v609_v2 = vpop.eup %608 }
  0xe6   :  { %541 = vst.msk [vmem:[#allocation2] sm:$0xff] %vm540_vm3, %v538_v1  ;;  %v611_v3 = vpop.eup %610  ;;  %v322_v4 = vxor.u32 2147483648, %v609_v2 }
  0xe7   :  { %v319_v55 = vxor.u32 2147483648, %v611_v3 }
  0xe8   :  { %v323_v5 = vsel %vm321_vm4, %v322_v4, %v611_v3  ;;  %v529_v6 = vsel %vm527_vm5, %v322_v4, %v611_v3 }
  0xe9   :  { %v320_v9 = vsel %vm318_vm6, %v609_v2, %v319_v55  ;;  %v526_v10 = vsel %vm524_vm7, %v609_v2, %v319_v55 }
  0xea   :  { %v324_v53 = vsel %vm317_vm8, %v320_v9, %v323_v5  ;;  %v530_v13 = vsel %vm523_vm9, %v526_v10, %v529_v6 }
  0xeb   :  { %v325_v8 = vsel %vm314_vm11, nan, %v324_v53  ;;  %v531_v15 = vsel %vm314_vm11, nan, %v530_v13 }
  0xec   :  { %v535_v18 = vsel %vm743_vm10, %v531_v15, %v325_v8 }
  0xed   :  { %v539_v19 = vsel %vm13_vm0, %v678_v54, %v535_v18 }
  0xee   :  { %542 = vst.msk [vmem:[#allocation2 + $0x8] sm:$0xff] %vm540_vm3, %v539_v19 }
  0xef   :  { %623 = shalt.err (!%p620_p4)
}
  0xf0   :  { %s624_s14 = scalar_lea.hbm %s774_s1, 256 }
  0xf1   :  { %p625_p5 = scmp.ne.s32.totalorder %s774_s1, %s624_s14  ;;  %p628_p6 = scmp.lt.u32.totalorder %s624_s14, %s774_s1 }
  0xf3   :  { %p630_p7 = pnand %p628_p6, %p625_p5 }
  0xf5   :  { %633 = shalt.err (!%p630_p7)
}
  0xf6   :  { %s648_s19 = smov 128   ;;  %s649_s20 = smov 8  }
  0xf7   :  { %554 = dma.vmem_to_hbm [thread:$0]  %s549_s10, 256, %s774_s1, [#allocation3], %s648_s19, %s648_s19, %s649_s20  }
  0xf8   :  { %634 = dma.done.wait [#allocation3], 256  }
  0xf9   :  { %635 = vsyncadd [#allocation3], 4294967040 }
  0xfa   :  { %558 = vsyncpa [#allocation3], 1 }

</bundles_post_ra>
